<compile_context>
chip_gen: v6e
topology: v6e:2x2x1
jax: 0.10.0
libtpu: 0.0.40
codegen_flags: <defaults>
</compile_context>

<pallas_src>
import jax
import jax.numpy as jnp
from jax.experimental import pallas as pl
from jax.experimental.pallas import tpu as pltpu


def _round_up(x, m):
    return ((x + m - 1) // m) * m


def _vmem_capacity_bytes():
    """Per-TensorCore VMEM capacity, with a safe (v7x) fallback."""
    try:
        return int(pltpu.get_tpu_info().vmem_capacity_bytes)
    except Exception:
        return 64 * 1024 * 1024


# --------------------------------------------------------------------------
# Kernels
# --------------------------------------------------------------------------
def ffn_kernel_resident(x_ref, w1_ref, b1_ref, w2_ref, b2_ref, o_ref):
    # x_ref:  [tm, dm]        (dm = padded d_model)
    # w1_ref: [dm, df], b1_ref: [1, df]   (full padded d_ff, resident in VMEM)
    # w2_ref: [df, dm], b2_ref: [1, dm]
    # o_ref:  [tm, dm]
    h = jnp.dot(x_ref[...], w1_ref[...], preferred_element_type=jnp.float32)
    h = jnp.maximum(h + b1_ref[...], 0.0)
    # TODO(synk): training-mode dropout (eval mode == identity, matches .eval()).
    out = jnp.dot(h.astype(w2_ref.dtype), w2_ref[...],
                  preferred_element_type=jnp.float32)
    o_ref[...] = (out + b2_ref[...]).astype(o_ref.dtype)


def ffn_kernel_streamed(x_ref, w1_ref, b1_ref, w2_ref, b2_ref, o_ref, acc_ref):
    # x_ref:  [tm, dm]      (resident across the d_ff axis)
    # w1_ref: [dm, tf], b1_ref: [1, tf]          (current d_ff tile)
    # w2_ref: [tf, dm], b2_ref: [1, dm]
    # o_ref:  [tm, dm]      acc_ref: [tm, dm] f32 scratch (resident across j)
    j = pl.program_id(1)

    @pl.when(j == 0)
    def _():
        acc_ref[...] = jnp.zeros_like(acc_ref)

    h = jnp.dot(x_ref[...], w1_ref[...], preferred_element_type=jnp.float32)
    h = jnp.maximum(h + b1_ref[...], 0.0)
    # TODO(synk): training-mode dropout (eval mode == identity, matches .eval()).
    acc_ref[...] += jnp.dot(h.astype(w2_ref.dtype), w2_ref[...],
                            preferred_element_type=jnp.float32)

    @pl.when(j == pl.num_programs(1) - 1)
    def _():
        o_ref[...] = (acc_ref[...] + b2_ref[...]).astype(o_ref.dtype)


# --------------------------------------------------------------------------
# Wrapper
# --------------------------------------------------------------------------
def feed_forward(x, w1, b1, w2, b2, *, tm=None, tf=None, compute_dtype=None,
                 force_streamed=False):
    """x: [B, S, d_model]; w1: [d_model, d_ff]; b1: [d_ff];
    w2: [d_ff, d_model]; b2: [d_model] -> [B, S, d_model].

    compute_dtype: dtype used on the MXU for x/w1/w2 (e.g. jnp.bfloat16);
    accumulation / bias / ReLU stay in f32. Default = x.dtype.
    """
    B, S, d_model = x.shape
    d_ff = w1.shape[1]
    assert w1.shape == (d_model, d_ff)
    assert b1.shape == (d_ff,)
    assert w2.shape == (d_ff, d_model)
    assert b2.shape == (d_model,)

    out_dtype = x.dtype
    cdt = jnp.dtype(out_dtype) if compute_dtype is None else jnp.dtype(compute_dtype)
    it_c = cdt.itemsize
    it_o = jnp.dtype(out_dtype).itemsize

    M = B * S
    dm_p = _round_up(d_model, 128)          # lane-dense output / K dim
    df_p = _round_up(d_ff, 128)

    vmem_budget = int(_vmem_capacity_bytes() * 0.75)

    # ---- M tile: large default (hides weight streaming), shrunk for small M,
    # ---- split in two when one tile would cover all of M (v7x megacore). ----
    if tm is None:
        tm = min(512, _round_up(M, 8))
        if tm >= M and M >= 256:
            tm = _round_up(-(-M // 2), 8)
    tm = max(8, _round_up(tm, 8))
    M_p = _round_up(M, tm)

    # ---- VMEM footprint models (include h and its cast copy, f32 epilogue). --
    def resident_bytes(tm_):
        return (2 * 2 * dm_p * df_p * it_c              # w1 + w2 (x2 buffering slack)
                + 2 * tm_ * dm_p * (it_c + it_o)        # x / out tiles (double-buffered)
                + tm_ * df_p * (4 + it_c)               # h (f32) + cast copy
                + tm_ * dm_p * 4                        # f32 pre-cast output
                + 4 * (df_p + dm_p) * 4)                # biases + slack

    def streamed_bytes(tm_, tf_):
        return (2 * tm_ * dm_p * it_c                   # x tile (double-buffered)
                + 2 * 2 * dm_p * tf_ * it_c             # w1 / w2 tiles (double-buffered)
                + 2 * tm_ * dm_p * it_o                 # out tile
                + tm_ * dm_p * 4                        # f32 accumulator (single)
                + tm_ * tf_ * (4 + it_c)                # h (f32) + cast copy
                + 4 * (tf_ + dm_p) * 4)                 # biases + slack

    use_resident = (not force_streamed) and resident_bytes(tm) <= vmem_budget

    if not use_resident:
        # d_ff tile: wide default (fewer accumulator read-modify-writes).
        if tf is None:
            tf = 1024
        tf = min(_round_up(tf, 128), df_p)
        while df_p % tf != 0:
            tf -= 128
        # Shrink tf first (keeps the per-step compute/DMA ratio ~ tm), then tm.
        while streamed_bytes(tm, tf) > vmem_budget and tf > 256:
            tf = max(256, tf // 2)
            while df_p % tf != 0:
                tf -= 128
        while streamed_bytes(tm, tf) > vmem_budget and tm > 128:
            tm = max(128, _round_up(tm // 2, 8))
            M_p = _round_up(M, tm)

    # ---- Padding (exact: padded d_ff cols give relu(0)=0 into zero rows of
    # ---- w2; padded d_model / M rows are sliced off) + compute-dtype cast. --
    x2d = jnp.pad(x.reshape(M, d_model).astype(cdt),
                  ((0, M_p - M), (0, dm_p - d_model)))
    w1p = jnp.pad(w1.astype(cdt), ((0, dm_p - d_model), (0, df_p - d_ff)))
    b1p = jnp.pad(b1.astype(jnp.float32), ((0, df_p - d_ff),)).reshape(1, df_p)
    w2p = jnp.pad(w2.astype(cdt), ((0, df_p - d_ff), (0, dm_p - d_model)))
    b2p = jnp.pad(b2.astype(jnp.float32), ((0, dm_p - d_model),)).reshape(1, dm_p)

    need = resident_bytes(tm) if use_resident else streamed_bytes(tm, tf)
    vmem_limit = int(min(max(int(need * 1.25), 32 * 1024 * 1024), vmem_budget))

    weight_reads = 1 if use_resident else (M_p // tm)
    cost = pl.CostEstimate(
        flops=4 * M_p * dm_p * df_p,                       # two matmuls
        transcendentals=0,
        bytes_accessed=(M_p * dm_p * it_c                  # x read
                        + M_p * dm_p * it_o                # out write
                        + weight_reads * 2 * dm_p * df_p * it_c),
    )

    if use_resident:
        grid = (M_p // tm,)
        out2d = pl.pallas_call(
            ffn_kernel_resident,
            out_shape=jax.ShapeDtypeStruct((M_p, dm_p), out_dtype),
            grid_spec=pltpu.PrefetchScalarGridSpec(
                num_scalar_prefetch=0,
                grid=grid,
                in_specs=[
                    pl.BlockSpec((tm, dm_p), lambda i: (i, 0)),     # x
                    pl.BlockSpec((dm_p, df_p), lambda i: (0, 0)),   # w1 (resident)
                    pl.BlockSpec((1, df_p), lambda i: (0, 0)),      # b1
                    pl.BlockSpec((df_p, dm_p), lambda i: (0, 0)),   # w2 (resident)
                    pl.BlockSpec((1, dm_p), lambda i: (0, 0)),      # b2
                ],
                out_specs=pl.BlockSpec((tm, dm_p), lambda i: (i, 0)),
            ),
            compiler_params=pltpu.CompilerParams(
                dimension_semantics=("parallel",),
                vmem_limit_bytes=vmem_limit,
            ),
            cost_estimate=cost,
        )(x2d, w1p, b1p, w2p, b2p)
    else:
        grid = (M_p // tm, df_p // tf)
        out2d = pl.pallas_call(
            ffn_kernel_streamed,
            out_shape=jax.ShapeDtypeStruct((M_p, dm_p), out_dtype),
            grid_spec=pltpu.PrefetchScalarGridSpec(
                num_scalar_prefetch=0,
                grid=grid,
                in_specs=[
                    pl.BlockSpec((tm, dm_p), lambda i, j: (i, 0)),   # x
                    pl.BlockSpec((dm_p, tf), lambda i, j: (0, j)),   # w1 tile
                    pl.BlockSpec((1, tf), lambda i, j: (0, j)),      # b1 tile
                    pl.BlockSpec((tf, dm_p), lambda i, j: (j, 0)),   # w2 tile
                    pl.BlockSpec((1, dm_p), lambda i, j: (0, 0)),    # b2
                ],
                out_specs=pl.BlockSpec((tm, dm_p), lambda i, j: (i, 0)),
                scratch_shapes=[pltpu.VMEM((tm, dm_p), jnp.float32)],
            ),
            compiler_params=pltpu.CompilerParams(
                dimension_semantics=("parallel", "arbitrary"),
                vmem_limit_bytes=vmem_limit,
            ),
            cost_estimate=cost,
        )(x2d, w1p, b1p, w2p, b2p)

    return out2d[:M, :d_model].reshape(B, S, d_model)


# --------------------------------------------------------------------------
# Params / reference / tests
# --------------------------------------------------------------------------
def init_params(key, d_model, d_ff, dtype=jnp.float32):
    """Deterministic init matching nn.Linear's U(-1/sqrt(fan_in), 1/sqrt(fan_in))."""
    k1, k2, k3, k4 = jax.random.split(key, 4)
    bound1 = 1.0 / (d_model ** 0.5)
    bound2 = 1.0 / (d_ff ** 0.5)
    # stored as [in, out] (transposed relative to PyTorch's [out, in])
    w1 = jax.random.uniform(k1, (d_model, d_ff), dtype, -bound1, bound1)
    b1 = jax.random.uniform(k2, (d_ff,), dtype, -bound1, bound1)
    w2 = jax.random.uniform(k3, (d_ff, d_model), dtype, -bound2, bound2)
    b2 = jax.random.uniform(k4, (d_model,), dtype, -bound2, bound2)
    return w1, b1, w2, b2


def _reference(x, w1, b1, w2, b2):
    h = jnp.maximum(jnp.dot(x, w1, precision="highest") + b1, 0.0)
    return jnp.dot(h, w2, precision="highest") + b2


if __name__ == "__main__":
    key = jax.random.PRNGKey(0)

    # --- Test 1: small shapes matching the module's toy config (resident) --
    batch, seq, d_model, d_ff = 2, 8, 32, 64
    kx, kp, key = jax.random.split(key, 3)
    x = jax.random.normal(kx, (batch, seq, d_model), jnp.float32)
    w1, b1, w2, b2 = init_params(kp, d_model, d_ff)

    y = feed_forward(x, w1, b1, w2, b2)
    jax.block_until_ready(y)
    ref = _reference(x, w1, b1, w2, b2)
    assert y.shape == (batch, seq, d_model)
    assert jnp.allclose(y, ref, atol=5e-3, rtol=5e-3)

    # --- Test 2: non-aligned dims, forced streamed path (multiple M and d_ff
    #             tiles -> exercises padding + accumulator init/finalize) ----
    batch2, seq2, d_model2, d_ff2 = 3, 100, 192, 640
    kx2, kp2, key = jax.random.split(key, 3)
    x2 = jax.random.normal(kx2, (batch2, seq2, d_model2), jnp.float32)
    w1b, b1b, w2b, b2b = init_params(kp2, d_model2, d_ff2)

    y2 = feed_forward(x2, w1b, b1b, w2b, b2b, tf=128, force_streamed=True)
    jax.block_until_ready(y2)
    ref2 = _reference(x2, w1b, b1b, w2b, b2b)
    assert y2.shape == (batch2, seq2, d_model2)
    assert jnp.allclose(y2, ref2, atol=5e-3, rtol=5e-3)

    # --- Test 3: bf16 compute path (f32 accumulation), resident weights -----
    batch3, seq3, d_model3, d_ff3 = 2, 128, 128, 512
    kx3, kp3 = jax.random.split(key)
    x3 = jax.random.normal(kx3, (batch3, seq3, d_model3), jnp.float32)
    w1c, b1c, w2c, b2c = init_params(kp3, d_model3, d_ff3)

    y3 = feed_forward(x3, w1c, b1c, w2c, b2c, compute_dtype=jnp.bfloat16)
    jax.block_until_ready(y3)
    ref3 = _reference(x3, w1c, b1c, w2c, b2c)
    assert y3.shape == (batch3, seq3, d_model3)
    assert jnp.allclose(y3, ref3, atol=5e-2, rtol=5e-2)

    print("KERNEL_OK")
</pallas_src>

<mosaic_0001>
module attributes {stable_mosaic.version = 11 : i64} {
  func.func @ffn_kernel_resident(%arg0: i32, %arg1: memref<16x128xf32, #tpu.memory_space<vmem>>, %arg2: memref<128x128xf32, #tpu.memory_space<vmem>>, %arg3: memref<1x128xf32, #tpu.memory_space<vmem>>, %arg4: memref<128x128xf32, #tpu.memory_space<vmem>>, %arg5: memref<1x128xf32, #tpu.memory_space<vmem>>, %arg6: memref<16x128xf32, #tpu.memory_space<vmem>>) attributes {dimension_semantics = [#tpu.dimension_semantics<parallel>], iteration_bounds = array<i64: 1>, scalar_prefetch = 0 : i64, scratch_operands = 0 : i64, tpu.core_type = #tpu.core_type<tc>, window_params = [{transform_indices = @transform_0, window_bounds = array<i64: 16, 128>}, {pipeline_mode = #tpu.pipeline_mode<synchronous>, transform_indices = @transform_1, window_bounds = array<i64: 128, 128>}, {pipeline_mode = #tpu.pipeline_mode<synchronous>, transform_indices = @transform_2, window_bounds = array<i64: 1, 128>}, {pipeline_mode = #tpu.pipeline_mode<synchronous>, transform_indices = @transform_3, window_bounds = array<i64: 128, 128>}, {pipeline_mode = #tpu.pipeline_mode<synchronous>, transform_indices = @transform_4, window_bounds = array<i64: 1, 128>}, {transform_indices = @transform_5, window_bounds = array<i64: 16, 128>}]} {
    %c0 = arith.constant 0 : index
    %c0_0 = arith.constant 0 : index
    %0 = vector.load %arg1[%c0, %c0_0] : memref<16x128xf32, #tpu.memory_space<vmem>>, vector<16x128xf32>
    %c0_1 = arith.constant 0 : index
    %c0_2 = arith.constant 0 : index
    %1 = vector.load %arg2[%c0_1, %c0_2] : memref<128x128xf32, #tpu.memory_space<vmem>>, vector<128x128xf32>
    %cst = arith.constant dense<0.000000e+00> : vector<16x128xf32>
    %2 = tpu.matmul %0, %1, %cst {dimension_numbers = #tpu.dot_dimension_numbers<[1], [0], [0], [1], [0, 0, 1, 1], [], []>} : vector<16x128xf32>, vector<128x128xf32>, vector<16x128xf32> -> vector<16x128xf32>
    %c0_3 = arith.constant 0 : index
    %c0_4 = arith.constant 0 : index
    %3 = vector.load %arg3[%c0_3, %c0_4] : memref<1x128xf32, #tpu.memory_space<vmem>>, vector<1x128xf32>
    %4 = vector.broadcast %3 : vector<1x128xf32> to vector<16x128xf32>
    %5 = arith.addf %2, %4 : vector<16x128xf32>
    %cst_5 = arith.constant 0.000000e+00 : f32
    %6 = vector.broadcast %cst_5 : f32 to vector<16x128xf32>
    %7 = arith.maximumf %5, %6 : vector<16x128xf32>
    %c0_6 = arith.constant 0 : index
    %c0_7 = arith.constant 0 : index
    %8 = vector.load %arg4[%c0_6, %c0_7] : memref<128x128xf32, #tpu.memory_space<vmem>>, vector<128x128xf32>
    %cst_8 = arith.constant dense<0.000000e+00> : vector<16x128xf32>
    %9 = tpu.matmul %7, %8, %cst_8 {dimension_numbers = #tpu.dot_dimension_numbers<[1], [0], [0], [1], [0, 0, 1, 1], [], []>} : vector<16x128xf32>, vector<128x128xf32>, vector<16x128xf32> -> vector<16x128xf32>
    %c0_9 = arith.constant 0 : index
    %c0_10 = arith.constant 0 : index
    %10 = vector.load %arg5[%c0_9, %c0_10] : memref<1x128xf32, #tpu.memory_space<vmem>>, vector<1x128xf32>
    %11 = vector.broadcast %10 : vector<1x128xf32> to vector<16x128xf32>
    %12 = arith.addf %9, %11 : vector<16x128xf32>
    %c0_11 = arith.constant 0 : index
    %c0_12 = arith.constant 0 : index
    %13 = vector.load %arg6[%c0_11, %c0_12] : memref<16x128xf32, #tpu.memory_space<vmem>>, vector<16x128xf32>
    tpu.vector_store %arg6[%c0_11, %c0_12], %12 {strides = array<i32>} : memref<16x128xf32, #tpu.memory_space<vmem>>, vector<16x128xf32>,
    return
  }
  func.func @transform_0(%arg0: i32) -> (i32, i32) {
    %c0_i32 = arith.constant 0 : i32
    %c0_i32_0 = arith.constant 0 : i32
    return %arg0, %c0_i32 : i32, i32
  }
  func.func @transform_1(%arg0: i32) -> (i32, i32) {
    %c0_i32 = arith.constant 0 : i32
    %c0_i32_0 = arith.constant 0 : i32
    %c0_i32_1 = arith.constant 0 : i32
    return %c0_i32, %c0_i32_0 : i32, i32
  }
  func.func @transform_2(%arg0: i32) -> (i32, i32) {
    %c0_i32 = arith.constant 0 : i32
    %c0_i32_0 = arith.constant 0 : i32
    %c0_i32_1 = arith.constant 0 : i32
    return %c0_i32, %c0_i32_0 : i32, i32
  }
  func.func @transform_3(%arg0: i32) -> (i32, i32) {
    %c0_i32 = arith.constant 0 : i32
    %c0_i32_0 = arith.constant 0 : i32
    %c0_i32_1 = arith.constant 0 : i32
    return %c0_i32, %c0_i32_0 : i32, i32
  }
  func.func @transform_4(%arg0: i32) -> (i32, i32) {
    %c0_i32 = arith.constant 0 : i32
    %c0_i32_0 = arith.constant 0 : i32
    %c0_i32_1 = arith.constant 0 : i32
    return %c0_i32, %c0_i32_0 : i32, i32
  }
  func.func @transform_5(%arg0: i32) -> (i32, i32) {
    %c0_i32 = arith.constant 0 : i32
    %c0_i32_0 = arith.constant 0 : i32
    return %arg0, %c0_i32 : i32, i32
  }
}

</mosaic_0001>

<bundles_post_ra>
// kernel: tpu_custom_call.1
= control target key start
LH: loop header
LB: loop body
LE: loop exit
PB: predicated region body
PF: predicated region fallthrough
CT: control target
= control target key end

     0   :  { %10 = vsyncpa [#allocation3], 0  ;;  %s548_s0 = inlined_call_operand.hbm [shape: f32[16,128], index: 0, kind: input, shape index: {}]   ;;  %s549_s1 = inlined_call_operand.hbm [shape: f32[128,128], index: 1, kind: input, shape index: {}]   ;;  %s550_s2 = inlined_call_operand.vmem [shape: f32[1,128], index: 2, kind: input, shape index: {}]   ;;  %s551_s3 = inlined_call_operand.hbm [shape: f32[128,128], index: 3, kind: input, shape index: {}]   ;;  %s552_s4 = inlined_call_operand.vmem [shape: f32[1,128], index: 4, kind: input, shape index: {}]   ;;  %s553_s5 = inlined_call_operand.hbm [shape: f32[16,128], index: 5, kind: output, shape index: {}]  }
   0x1   :  { %11 = vsyncpa [#allocation6], 0 }
   0x2   :  { %12 = vsyncpa [#allocation4], 0  ;;  %s482_s18 = smov [#allocation5]   ;;  %s483_s20 = smov [#allocation2]  }
   0x3   :  { %s30_s19 = sshll.u32 %s482_s18, 4  ;;  %s18_s21 = sshll.u32 %s483_s20, 4  ;;  %s31_s19 = int_to_ptr.vmem [resolvable:$true] %s30_s19  ;;  %s19_s21 = int_to_ptr.vmem [resolvable:$true] %s18_s21 }
   0x4   :  { %s404_s22 = scalar_lea.vmem %s31_s19, 2048  ;;  %p409_p1 = scmp.lt.s32.totalorder %s31_s19, %s31_s19 }
   0x5   :  { %p405_p0 = scmp.ne.s32.totalorder %s31_s19, %s404_s22  ;;  %p410_p2 = scmp.lt.s32.totalorder %s404_s22, %s404_s22 }
   0x7   :  { %p411_p3 = por %p410_p2, %p409_p1 }
   0x9   :  { %p412_p4 = pnand %p411_p3, %p405_p0 }
   0xb   :  { %415 = shalt.err (!%p412_p4)
}
   0xc   :  { %s484_s23 = smov 128   ;;  %s485_s24 = smov 8  }
   0xd   :  { %36 = dma.hbm_to_vmem [thread:$0]  %s549_s1, 2048, %s31_s19, [#allocation6], %s484_s23, %s484_s23, %s485_s24  }
   0xe   :  { %s424_s27 = scalar_lea.vmem %s19_s21, 256  ;;  %p429_p6 = scmp.lt.s32.totalorder %s19_s21, %s19_s21 }
   0xf   :  { %p425_p5 = scmp.ne.s32.totalorder %s19_s21, %s424_s27  ;;  %p430_p7 = scmp.lt.s32.totalorder %s424_s27, %s424_s27 }
  0x11   :  { %p431_p8 = por %p430_p7, %p429_p6 }
  0x13   :  { %p432_p9 = pnand %p431_p8, %p425_p5 }
  0x15   :  { %435 = shalt.err (!%p432_p9)
}
  0x16   :  { %24 = dma.hbm_to_vmem [thread:$0]  %s548_s0, 256, %s19_s21, [#allocation3], %s484_s23, %s484_s23, %s485_s24  }
  0x17   :  { %s486_s30 = smov [#allocation7]  }
  0x18   :  { %s44_s6 = sshll.u32 %s486_s30, 4  ;;  %s45_s6 = int_to_ptr.vmem [resolvable:$true] %s44_s6 }
  0x19   :  { %s444_s7 = scalar_lea.vmem %s45_s6, 2048  ;;  %p449_p11 = scmp.lt.s32.totalorder %s45_s6, %s45_s6 }
  0x1a   :  { %p445_p10 = scmp.ne.s32.totalorder %s45_s6, %s444_s7  ;;  %p450_p12 = scmp.lt.s32.totalorder %s444_s7, %s444_s7 }
  0x1c   :  { %p451_p13 = por %p450_p12, %p449_p11 }
  0x1e   :  { %p452_p0 = pnand %p451_p13, %p445_p10 }
  0x20   :  { %455 = shalt.err (!%p452_p0)
}
  0x21   :  { %50 = dma.hbm_to_vmem [thread:$0]  %s551_s3, 2048, %s45_s6, [#allocation6], %s484_s23, %s484_s23, %s485_s24  }
  0x22   :  { %476 = dma.done.wait [#allocation3], 256  }
  0x23   :  { %477 = vsyncadd [#allocation3], 4294967040 }
  0x24   :  { %478 = dma.done.wait [#allocation6], 4096  }
  0x25   :  { %479 = vsyncadd [#allocation6], 4294963200  ;;  %v79_v0 = vld [vmem:[#allocation5 + $0x78] sm:$0xff]  ;;  %v78_v1 = vld [vmem:[#allocation5 + $0x70] sm:$0xff]  ;;  %s487_s11 = smov [#allocation8]  }
  0x26   :  { %320 = vmatprep.subr.mxu0 %v79_v0  ;;  %v77_v2 = vld [vmem:[#allocation5 + $0x68] sm:$0xff]  ;;  %v76_v3 = vld [vmem:[#allocation5 + $0x60] sm:$0xff]  ;;  %v62_v4 = vld [vmem:[#allocation2] sm:$0xff]  ;;  %s269_s12 = sshll.u32 %s487_s11, 4  ;;  %s270_s12 = int_to_ptr.vmem [resolvable:$true] %s269_s12 }
  0x27   :  { %321 = vmatpush3.msra.mxu0 %v79_v0  ;;  %v75_v5 = vld [vmem:[#allocation5 + $0x58] sm:$0xff]  ;;  %352 = vmatprep.mubr.f32.mxu0 %v62_v4  ;;  %v178_v7 = vld [vmem:[#allocation7 + $0x70] sm:$0xff]  ;;  %v177_v9 = vld [vmem:[#allocation7 + $0x68] sm:$0xff]  ;;  %p461_p2 = scmp.lt.s32.totalorder %s270_s12, %s270_s12 }
  0x28   :  { %322 = vmatprep.subr.mxu0 %v78_v1  ;;  %v179_v6 = vld [vmem:[#allocation7 + $0x78] sm:$0xff]  ;;  %v74_v8 = vld [vmem:[#allocation5 + $0x50] sm:$0xff]  ;;  %v73_v10 = vld [vmem:[#allocation5 + $0x48] sm:$0xff] }
  0x29   :  { %323 = vmatpush3.msra.mxu0 %v78_v1  ;;  %355 = vmatprep.subr.mxu1 %v179_v6  ;;  %v176_v11 = vld [vmem:[#allocation7 + $0x60] sm:$0xff]  ;;  %v175_v13 = vld [vmem:[#allocation7 + $0x58] sm:$0xff]  ;;  %v174_v15 = vld [vmem:[#allocation7 + $0x50] sm:$0xff] }
  0x2a   :  { %324 = vmatprep.subr.mxu0 %v77_v2  ;;  %356 = vmatpush3.msra.mxu1 %v179_v6  ;;  %v72_v12 = vld [vmem:[#allocation5 + $0x40] sm:$0xff]  ;;  %v71_v14 = vld [vmem:[#allocation5 + $0x38] sm:$0xff]  ;;  %v70_v16 = vld [vmem:[#allocation5 + $0x30] sm:$0xff] }
  0x2b   :  { %325 = vmatpush3.msra.mxu0 %v77_v2  ;;  %357 = vmatprep.subr.mxu1 %v178_v7  ;;  %v173_v17 = vld [vmem:[#allocation7 + $0x48] sm:$0xff]  ;;  %v172_v19 = vld [vmem:[#allocation7 + $0x40] sm:$0xff]  ;;  %v171_v21 = vld [vmem:[#allocation7 + $0x38] sm:$0xff] }
  0x2c   :  { %326 = vmatprep.subr.mxu0 %v76_v3  ;;  %358 = vmatpush3.msra.mxu1 %v178_v7  ;;  %v69_v18 = vld [vmem:[#allocation5 + $0x28] sm:$0xff]  ;;  %v68_v20 = vld [vmem:[#allocation5 + $0x20] sm:$0xff]  ;;  %v67_v22 = vld [vmem:[#allocation5 + $0x18] sm:$0xff] }
  0x2d   :  { %327 = vmatpush3.msra.mxu0 %v76_v3  ;;  %359 = vmatprep.subr.mxu1 %v177_v9  ;;  %v170_v23 = vld [vmem:[#allocation7 + $0x30] sm:$0xff]  ;;  %v169_v25 = vld [vmem:[#allocation7 + $0x28] sm:$0xff]  ;;  %v168_v27 = vld [vmem:[#allocation7 + $0x20] sm:$0xff] }
  0x2e   :  { %328 = vmatprep.subr.mxu0 %v75_v5  ;;  %360 = vmatpush3.msra.mxu1 %v177_v9  ;;  %v66_v24 = vld [vmem:[#allocation5 + $0x10] sm:$0xff]  ;;  %v65_v26 = vld [vmem:[#allocation5 + $0x8] sm:$0xff]  ;;  %v64_v28 = vld [vmem:[#allocation5] sm:$0xff] }
  0x2f   :  { %329 = vmatpush3.msra.mxu0 %v75_v5  ;;  %361 = vmatprep.subr.mxu1 %v176_v11  ;;  %v63_v29 = vld [vmem:[#allocation2 + $0x8] sm:$0xff]  ;;  %v166_v31 = vld [vmem:[#allocation7 + $0x10] sm:$0xff]  ;;  %v165_v32 = vld [vmem:[#allocation7 + $0x8] sm:$0xff] }
  0x30   :  { %330 = vmatprep.subr.mxu0 %v74_v8  ;;  %362 = vmatpush3.msra.mxu1 %v176_v11  ;;  %v167_v30 = vld [vmem:[#allocation7 + $0x18] sm:$0xff]  ;;  %v164_v33 = vld [vmem:[#allocation7] sm:$0xff]  ;;  %v282_v34 = vld [vmem:[%s550_s2] ss:$0 sm:$0xff]  ;;  %s456_s2 = scalar_lea.vmem %s270_s12, 256 }
  0x31   :  { %331 = vmatpush3.msra.mxu0 %v74_v8  ;;  %363 = vmatprep.subr.mxu1 %v175_v13  ;;  %v283_v41 = vld [vmem:[%s552_s4] ss:$0 sm:$0xff]  ;;  %p457_p1 = scmp.ne.s32.totalorder %s270_s12, %s456_s2  ;;  %p462_p3 = scmp.lt.s32.totalorder %s456_s2, %s456_s2 }
  0x32   :  { %332 = vmatprep.subr.mxu0 %v73_v10  ;;  %364 = vmatpush3.msra.mxu1 %v175_v13 }
  0x33   :  { %333 = vmatpush3.msra.mxu0 %v73_v10  ;;  %365 = vmatprep.subr.mxu1 %v174_v15  ;;  %p463_p4 = por %p462_p3, %p461_p2 }
  0x34   :  { %334 = vmatprep.subr.mxu0 %v72_v12  ;;  %366 = vmatpush3.msra.mxu1 %v174_v15 }
  0x35   :  { %335 = vmatpush3.msra.mxu0 %v72_v12  ;;  %367 = vmatprep.subr.mxu1 %v173_v17  ;;  %p464_p5 = pnand %p463_p4, %p457_p1 }
  0x36   :  { %336 = vmatprep.subr.mxu0 %v71_v14  ;;  %368 = vmatpush3.msra.mxu1 %v173_v17 }
  0x37   :  { %337 = vmatpush3.msra.mxu0 %v71_v14  ;;  %369 = vmatprep.subr.mxu1 %v172_v19 }
  0x38   :  { %338 = vmatprep.subr.mxu0 %v70_v16  ;;  %370 = vmatpush3.msra.mxu1 %v172_v19 }
  0x39   :  { %339 = vmatpush3.msra.mxu0 %v70_v16  ;;  %371 = vmatprep.subr.mxu1 %v171_v21 }
  0x3a   :  { %340 = vmatprep.subr.mxu0 %v69_v18  ;;  %372 = vmatpush3.msra.mxu1 %v171_v21 }
  0x3b   :  { %341 = vmatpush3.msra.mxu0 %v69_v18  ;;  %373 = vmatprep.subr.mxu1 %v170_v23 }
  0x3c   :  { %342 = vmatprep.subr.mxu0 %v68_v20  ;;  %374 = vmatpush3.msra.mxu1 %v170_v23 }
  0x3d   :  { %343 = vmatpush3.msra.mxu0 %v68_v20  ;;  %375 = vmatprep.subr.mxu1 %v169_v25 }
  0x3e   :  { %344 = vmatprep.subr.mxu0 %v67_v22  ;;  %376 = vmatpush3.msra.mxu1 %v169_v25 }
  0x3f   :  { %345 = vmatpush3.msra.mxu0 %v67_v22  ;;  %377 = vmatprep.subr.mxu1 %v168_v27 }
  0x40   :  { %346 = vmatprep.subr.mxu0 %v66_v24  ;;  %378 = vmatpush3.msra.mxu1 %v168_v27 }
  0x41   :  { %347 = vmatpush3.msra.mxu0 %v66_v24  ;;  %379 = vmatprep.subr.mxu1 %v167_v30 }
  0x42   :  { %348 = vmatprep.subr.mxu0 %v65_v26  ;;  %380 = vmatpush3.msra.mxu1 %v167_v30 }
  0x43   :  { %349 = vmatpush3.msra.mxu0 %v65_v26  ;;  %381 = vmatprep.subr.mxu1 %v166_v31 }
  0x44   :  { %350 = vmatprep.subr.mxu0 %v64_v28  ;;  %382 = vmatpush3.msra.mxu1 %v166_v31 }
  0x45   :  { %351 = vmatpush3.msra.mxu0 %v64_v28  ;;  %383 = vmatprep.subr.mxu1 %v165_v32 }
  0x46   :  { %353 = vmatmul.mubr.f32.vlgmr.msra.gmra.mxu0 %v63_v29  ;;  %384 = vmatpush3.msra.mxu1 %v165_v32 }
  0x47   :  { %385 = vmatprep.subr.mxu1 %v164_v33 }
  0x48   :  { %386 = vmatpush3.msra.mxu1 %v164_v33 }
 0x106   :  { %v354_v35 = vpop.f32.mrf.mxu0 }
 0x107   :  { %v159_v36 = vadd.f32 %v354_v35, %v282_v34 }
 0x108   :  { %v153_v37 = vpop.f32.mrf.mxu0 }
 0x109   :  { %v154_v38 = vadd.f32 %v282_v34, %v153_v37  ;;  %v163_v40 = vmax.f32 %v159_v36, 0.0 }
 0x10b   :  { %v162_v39 = vmax.f32 %v154_v38, 0.0 }
 0x10d   :  { %387 = vmatprep.mubr.f32.mxu1 %v162_v39 }
 0x10e   :  { %388 = vmatmul.mubr.f32.vlgmr.msra.gmra.mxu1 %v163_v40 }
 0x1ce   :  { %v389_v42 = vpop.f32.mrf.mxu1 }
 0x1cf   :  { %v259_v43 = vadd.f32 %v389_v42, %v283_v41 }
 0x1d0   :  { %v253_v44 = vpop.f32.mrf.mxu1 }
 0x1d1   :  { %263 = vst [vmem:[#allocation8 + $0x8] sm:$0xff] %v259_v43  ;;  %v254_v45 = vadd.f32 %v283_v41, %v253_v44 }
 0x1d3   :  { %262 = vst [vmem:[#allocation8] sm:$0xff] %v254_v45 }
 0x1d4   :  { %467 = shalt.err (!%p464_p5)
}
 0x1d5   :  { %275 = dma.vmem_to_hbm [thread:$0]  %s270_s12, 256, %s553_s5, [#allocation4], %s484_s23, %s484_s23, %s485_s24  }
 0x1d6   :  { %480 = dma.done.wait [#allocation4], 256  }
 0x1d7   :  { %481 = vsyncadd [#allocation4], 4294967040 }
 0x1d8   :  { %279 = vsyncpa [#allocation3], 1 }
 0x1d9   :  { %280 = vsyncpa [#allocation6], 1 }
 0x1da   :  { %281 = vsyncpa [#allocation4], 1 }

</bundles_post_ra>
